<compile_context>
chip_gen: v7x
topology: tpu7x:2x2x1
jax: 0.10.0
libtpu: 0.0.40
codegen_flags: <defaults>
</compile_context>

<pallas_src>
import functools
import math

import jax
import jax.numpy as jnp
from jax import lax
from jax.experimental import pallas as pl
from jax.experimental.pallas import tpu as pltpu

_BN_EPS = 1e-5
_LANE = 128
_FUSED_MAX_TILES = 4   # use the single-launch fused kernel up to this many tiles


def _round_up(x, m):
    return (x + m - 1) // m * m


def _vmem_budget_bytes():
    """Scoped-VMEM budget per pallas_call.

    Uses the physical capacity when queryable (v5e/v6e: 128 MiB, v7x: 64 MiB),
    keeps 25% headroom, never asks for more than 96 MiB.  This lifts v5e's tiny
    16 MiB default scoped limit while staying inside v7x's 64 MiB physical VMEM.
    """
    try:
        cap = int(pltpu.get_tpu_info().vmem_capacity_bytes)
    except Exception:
        cap = 64 << 20      # conservative (v7x-sized) fallback
    return min(cap * 3 // 4, 96 << 20)


def _pick_tile_rows(m, budget_bytes):
    """Row-tile size in lanes.

    The apply pass holds, double buffered, a (k<=8, TM) f32 input tile padded to
    8 sublanes plus a (1, TM) output tile also padded to 8 sublanes: ~128*TM
    bytes.  Keep ~192*TM <= budget (headroom for compiler temporaries / stats
    scratch), cap at 512K lanes, never exceed the 128-rounded problem size.
    """
    cap = (budget_bytes // 192) // _LANE * _LANE
    cap = max(_LANE, min(cap, 512 * 1024))
    return min(cap, _round_up(m, _LANE))


def _masked_shifted(xt_ref, pivot_ref, tile_start, m):
    """(x - pivot) with columns at global index >= m zeroed.

    Handles the partial tail tile (and any fully out-of-range clamped tile)
    without a wrapper-side jnp.pad; select is NaN-safe against garbage lanes.
    """
    xs = xt_ref[...] - pivot_ref[...]                               # (k, TM)
    col = lax.broadcasted_iota(jnp.int32, xs.shape, 1) + tile_start
    return jnp.where(col < m, xs, 0.0)


# ---------------------------------------------------------------------------
# Large-M path, pass 1: per-feature shifted sum / sum-of-squares.
# grid = (2, tiles_per_core); leading axis is a 2-way core split ("parallel",
# shards across v7x's two TensorCores, plain sequential on v5e/v6e).  Each core
# accumulates into its own (1, k, 1) partial output block; host sums them.
# ---------------------------------------------------------------------------
def _stats_kernel(xt_ref, pivot_ref, sum_ref, sumsq_ref, *, m, tm, tiles_per_core):
    core = pl.program_id(0)
    i = pl.program_id(1)

    @pl.when(i == 0)
    def _():
        sum_ref[...] = jnp.zeros_like(sum_ref)
        sumsq_ref[...] = jnp.zeros_like(sumsq_ref)

    start = (core * tiles_per_core + i) * tm            # global column offset
    xs = _masked_shifted(xt_ref, pivot_ref, start, m)   # (k, TM), masked
    sum_ref[...] += jnp.sum(xs, axis=1, keepdims=True)[None]        # (1, k, 1)
    sumsq_ref[...] += jnp.sum(xs * xs, axis=1, keepdims=True)[None]


# ---------------------------------------------------------------------------
# Large-M path, pass 2: out = sum_j x^T[j,:] * c[j] + c0
# Pure VPU multiply + sublane reduce, lane-dense (1, TM) stores, no MXU.
# Garbage tail lanes land in the out-of-bounds part of the last output block
# and are masked on writeback.
# ---------------------------------------------------------------------------
def _apply_kernel(xt_ref, c_ref, c0_ref, o_ref):
    y = jnp.sum(xt_ref[...] * c_ref[...], axis=0, keepdims=True)    # (1, TM)
    o_ref[...] = y + c0_ref[...]


# ---------------------------------------------------------------------------
# Small/medium-M path: single launch, grid = (2 phases, num_tiles).
#   phase 0: accumulate shifted stats into VMEM scratch.  The output block is
#            pinned to block 0 (index_map i*phase), so nothing is flushed.
#   phase 1, i == 0: fold BN stats + affine + Linear into (c, c0) in-kernel.
#   phase 1: apply, lane-dense stores.
# Removes the second launch and the stats HBM round trip.
# ---------------------------------------------------------------------------
def _fused_kernel(xt_ref, pivot_ref, gw_ref, bwb_ref, o_ref,
                  sum_ref, sumsq_ref, c_ref, c0_ref, *, m, tm):
    phase = pl.program_id(0)
    i = pl.program_id(1)

    @pl.when((phase == 0) & (i == 0))
    def _():
        sum_ref[...] = jnp.zeros_like(sum_ref)
        sumsq_ref[...] = jnp.zeros_like(sumsq_ref)

    @pl.when(phase == 0)
    def _():
        xs = _masked_shifted(xt_ref, pivot_ref, i * tm, m)
        sum_ref[...] += jnp.sum(xs, axis=1, keepdims=True)          # (k, 1)
        sumsq_ref[...] += jnp.sum(xs * xs, axis=1, keepdims=True)

    @pl.when((phase == 1) & (i == 0))
    def _():
        inv_m = jnp.float32(1.0 / m)
        d = sum_ref[...] * inv_m                     # E[x - pivot]
        mean = pivot_ref[...] + d
        # Pivot-shifted biased batch variance (avoids E[x^2]-mean^2 cancellation).
        var = jnp.maximum(sumsq_ref[...] * inv_m - d * d, 0.0)
        inv_std = lax.rsqrt(var + jnp.float32(_BN_EPS))
        c = inv_std * gw_ref[...]                    # gamma * W folded upstream
        c_ref[...] = c
        c0_ref[...] = bwb_ref[...] - jnp.sum(mean * c, keepdims=True)

    @pl.when(phase == 1)
    def _():
        y = jnp.sum(xt_ref[...] * c_ref[...], axis=0, keepdims=True)
        o_ref[...] = y + c0_ref[...]


def enhanced_linear_regression_fwd(x, gamma, beta, weight, bias, *, tile_rows=None):
    """x: (batch, N, k) float32 -> (batch, N) float32.

    BatchNorm1d(k) in training mode (biased batch stats, eps=1e-5, affine),
    Dropout(p=0.0) == identity, Linear(k -> 1).
    """
    batch, n, k = x.shape
    m = batch * n

    # Lane-dense layout: dense row axis M on lanes, k (=5) on sublanes.
    # TODO(synk): accept feature-major (k, M) input upstream to drop this
    # standalone HBM->HBM transpose pass.
    xt = x.reshape(m, k).astype(jnp.float32).T                      # (k, M)

    budget = _vmem_budget_bytes()
    if tile_rows is None:
        tm = _pick_tile_rows(m, budget)
    else:
        tm = min(_round_up(tile_rows, _LANE), _round_up(m, _LANE))
    num_tiles = pl.cdiv(m, tm)

    # Per-feature shift pivot (first row) for numerically stable batch variance.
    pivot = xt[:, :1]                                               # (k, 1)

    g = gamma.reshape(k, 1).astype(jnp.float32)
    b = beta.reshape(k, 1).astype(jnp.float32)
    w = weight.reshape(k, 1).astype(jnp.float32)                    # Linear weight
    bias_s = bias.reshape(()).astype(jnp.float32)

    # ---------------- small/medium M: single-launch fused kernel -------------
    if num_tiles <= _FUSED_MAX_TILES:
        gw = g * w                                                  # (k, 1)
        bwb = (bias_s + jnp.sum(b * w)).reshape(1, 1)               # (1, 1)
        out = pl.pallas_call(
            functools.partial(_fused_kernel, m=m, tm=tm),
            out_shape=jax.ShapeDtypeStruct((1, m), jnp.float32),
            grid=(2, num_tiles),
            in_specs=[pl.BlockSpec((k, tm), lambda p, i: (0, i)),   # x^T tile
                      pl.BlockSpec((k, 1), lambda p, i: (0, 0)),    # pivot
                      pl.BlockSpec((k, 1), lambda p, i: (0, 0)),    # gamma*W
                      pl.BlockSpec((1, 1), lambda p, i: (0, 0))],   # bias+sum(beta*W)
            # Pinned to block 0 while phase==0 (i*p == 0): the stats phase never
            # flushes garbage; phase 1 walks the blocks with valid data.
            out_specs=pl.BlockSpec((1, tm), lambda p, i: (0, i * p)),
            scratch_shapes=[pltpu.VMEM((k, 1), jnp.float32),        # sum
                            pltpu.VMEM((k, 1), jnp.float32),        # sumsq
                            pltpu.VMEM((k, 1), jnp.float32),        # folded c
                            pltpu.VMEM((1, 1), jnp.float32)],       # folded c0
            compiler_params=pltpu.CompilerParams(
                dimension_semantics=("arbitrary", "arbitrary"),
                vmem_limit_bytes=budget),
        )(xt, pivot, gw, bwb)
        return out.reshape(batch, n)

    # ---------------- large M: two launches, both TensorCore-parallel --------
    tiles_per_core = pl.cdiv(num_tiles, 2)

    s_parts, ss_parts = pl.pallas_call(
        functools.partial(_stats_kernel, m=m, tm=tm, tiles_per_core=tiles_per_core),
        out_shape=(jax.ShapeDtypeStruct((2, k, 1), jnp.float32),
                   jax.ShapeDtypeStruct((2, k, 1), jnp.float32)),
        grid=(2, tiles_per_core),
        in_specs=[
            # If num_tiles is odd the last (core=1) slot is clamped to the last
            # real tile; its contribution is zeroed by the in-kernel column mask.
            pl.BlockSpec((k, tm),
                         lambda c, i: (0, jnp.minimum(c * tiles_per_core + i,
                                                      num_tiles - 1))),
            pl.BlockSpec((k, 1), lambda c, i: (0, 0)),              # pivot
        ],
        out_specs=(pl.BlockSpec((1, k, 1), lambda c, i: (c, 0, 0)),
                   pl.BlockSpec((1, k, 1), lambda c, i: (c, 0, 0))),
        compiler_params=pltpu.CompilerParams(
            dimension_semantics=("parallel", "arbitrary"),
            vmem_limit_bytes=budget),
    )(xt, pivot)

    # Tiny (k,)-sized fold: combine per-core partials, BN stats + affine +
    # Linear collapse into one per-feature weight c and a scalar offset c0.
    inv_m = 1.0 / float(m)
    d = jnp.sum(s_parts, axis=0) * inv_m                            # (k, 1)
    mean = pivot + d
    var = jnp.maximum(jnp.sum(ss_parts, axis=0) * inv_m - d * d, 0.0)
    inv_std = lax.rsqrt(var + _BN_EPS)
    c = inv_std * g * w                                             # (k, 1)
    c0 = (bias_s + jnp.sum((b - mean * inv_std * g) * w)).reshape(1, 1)

    # Dropout(p=0.0) is the identity (module is None in the PyTorch spec).

    out = pl.pallas_call(
        _apply_kernel,
        out_shape=jax.ShapeDtypeStruct((1, m), jnp.float32),
        grid=(num_tiles,),
        in_specs=[pl.BlockSpec((k, tm), lambda i: (0, i)),          # x^T tile
                  pl.BlockSpec((k, 1), lambda i: (0, 0)),           # c (const)
                  pl.BlockSpec((1, 1), lambda i: (0, 0))],          # c0 (const)
        out_specs=pl.BlockSpec((1, tm), lambda i: (0, i)),
        compiler_params=pltpu.CompilerParams(
            dimension_semantics=("parallel",),                      # 2-TC on v7x
            vmem_limit_bytes=budget),
    )(xt, c, c0)
    return out.reshape(batch, n)


def _reference_fwd(x, gamma, beta, weight, bias):
    batch, n, k = x.shape
    xf = x.reshape(-1, k).astype(jnp.float32)
    mean = jnp.mean(xf, axis=0, keepdims=True)
    var = jnp.mean((xf - mean) ** 2, axis=0, keepdims=True)
    xn = (xf - mean) / jnp.sqrt(var + _BN_EPS) * gamma + beta
    out = xn @ weight.reshape(1, k).T + bias
    return out.reshape(batch, n)


if __name__ == "__main__":
    key = jax.random.PRNGKey(0)
    k_in, k_w, k_g, k_b, k_x2, k_x3 = jax.random.split(key, 6)

    k = 5
    gamma = 1.0 + 0.1 * jax.random.normal(k_g, (k,), dtype=jnp.float32)
    beta = 0.1 * jax.random.normal(k_b, (k,), dtype=jnp.float32)
    xavier_std = math.sqrt(2.0 / (k + 1))       # xavier_normal_ for Linear(k, 1)
    weight = xavier_std * jax.random.normal(k_w, (1, k), dtype=jnp.float32)
    bias = jnp.zeros((1,), dtype=jnp.float32)

    # 1) Module-sized shape (batch=2, N=16, k=5): one tile, fused single launch.
    x = jax.random.normal(k_in, (2, 16, k), dtype=jnp.float32)
    out = jax.block_until_ready(
        enhanced_linear_regression_fwd(x, gamma, beta, weight, bias))
    ref = _reference_fwd(x, gamma, beta, weight, bias)
    assert out.shape == (2, 16)
    assert jnp.allclose(out, ref, atol=1e-4, rtol=1e-5), "fused path (1 tile)"

    # 2) Multi-tile fused path with a partial tail tile (forced tm=128, M=300).
    x2 = jax.random.normal(k_x2, (2, 150, k), dtype=jnp.float32)
    out2 = jax.block_until_ready(
        enhanced_linear_regression_fwd(x2, gamma, beta, weight, bias, tile_rows=128))
    ref2 = _reference_fwd(x2, gamma, beta, weight, bias)
    assert jnp.allclose(out2, ref2, atol=1e-4, rtol=1e-5), "fused path (3 tiles)"

    # 3) Two-pass large-M path: odd tile count (M=600, tm=128 -> 5 tiles)
    #    exercises the 2-way core split, index clamping and tail masking.
    x3 = jax.random.normal(k_x3, (3, 200, k), dtype=jnp.float32)
    out3 = jax.block_until_ready(
        enhanced_linear_regression_fwd(x3, gamma, beta, weight, bias, tile_rows=128))
    ref3 = _reference_fwd(x3, gamma, beta, weight, bias)
    assert jnp.allclose(out3, ref3, atol=1e-4, rtol=1e-5), "two-pass path"

    print("KERNEL_OK")
</pallas_src>

<mosaic_0001>
module attributes {stable_mosaic.version = 11 : i64} {
  func.func @_fused_kernel(%arg0: i32, %arg1: i32, %arg2: memref<5x128xf32, #tpu.memory_space<vmem>>, %arg3: memref<5x1xf32, #tpu.memory_space<vmem>>, %arg4: memref<5x1xf32, #tpu.memory_space<vmem>>, %arg5: memref<1x1xf32, #tpu.memory_space<vmem>>, %arg6: memref<1x128xf32, #tpu.memory_space<vmem>>, %arg7: memref<5x1xf32, #tpu.memory_space<vmem>>, %arg8: memref<5x1xf32, #tpu.memory_space<vmem>>, %arg9: memref<5x1xf32, #tpu.memory_space<vmem>>, %arg10: memref<1x1xf32, #tpu.memory_space<vmem>>) attributes {dimension_semantics = [#tpu.dimension_semantics<arbitrary>, #tpu.dimension_semantics<arbitrary>], iteration_bounds = array<i64: 2, 1>, scalar_prefetch = 0 : i64, scratch_operands = 4 : i64, tpu.core_type = #tpu.core_type<tc>, window_params = [{transform_indices = @transform_0, window_bounds = array<i64: 5, 128>}, {pipeline_mode = #tpu.pipeline_mode<synchronous>, transform_indices = @transform_1, window_bounds = array<i64: 5, 1>}, {pipeline_mode = #tpu.pipeline_mode<synchronous>, transform_indices = @transform_2, window_bounds = array<i64: 5, 1>}, {pipeline_mode = #tpu.pipeline_mode<synchronous>, transform_indices = @transform_3, window_bounds = array<i64: 1, 1>}, {transform_indices = @transform_4, window_bounds = array<i64: 1, 128>}]} {
    %c0_i32 = arith.constant 0 : i32
    %0 = arith.cmpi eq, %arg0, %c0_i32 : i32
    %c0_i32_0 = arith.constant 0 : i32
    %1 = arith.cmpi eq, %arg1, %c0_i32_0 : i32
    %2 = arith.andi %0, %1 : i1
    %3 = arith.extui %2 : i1 to i32
    %c0_i32_1 = arith.constant 0 : i32
    %4 = arith.cmpi ne, %3, %c0_i32_1 : i32
    scf.if %4 {
      %cst = arith.constant 0.000000e+00 : f32
      %16 = vector.broadcast %cst : f32 to vector<5x1xf32>
      %c0 = arith.constant 0 : index
      %c0_8 = arith.constant 0 : index
      %17 = vector.load %arg7[%c0, %c0_8] : memref<5x1xf32, #tpu.memory_space<vmem>>, vector<5x1xf32>
      tpu.vector_store %arg7[%c0, %c0_8], %16 {strides = array<i32>} : memref<5x1xf32, #tpu.memory_space<vmem>>, vector<5x1xf32>,
      %cst_9 = arith.constant 0.000000e+00 : f32
      %18 = vector.broadcast %cst_9 : f32 to vector<5x1xf32>
      %c0_10 = arith.constant 0 : index
      %c0_11 = arith.constant 0 : index
      %19 = vector.load %arg8[%c0_10, %c0_11] : memref<5x1xf32, #tpu.memory_space<vmem>>, vector<5x1xf32>
      tpu.vector_store %arg8[%c0_10, %c0_11], %18 {strides = array<i32>} : memref<5x1xf32, #tpu.memory_space<vmem>>, vector<5x1xf32>,
    } else {
    }
    %c0_i32_2 = arith.constant 0 : i32
    %5 = arith.cmpi eq, %arg0, %c0_i32_2 : i32
    %6 = arith.extui %5 : i1 to i32
    %c0_i32_3 = arith.constant 0 : i32
    %7 = arith.cmpi ne, %6, %c0_i32_3 : i32
    scf.if %7 {
      %c128_i32 = arith.constant 128 : i32
      %16 = arith.muli %arg1, %c128_i32 : i32
      %c0 = arith.constant 0 : index
      %c0_8 = arith.constant 0 : index
      %17 = vector.load %arg2[%c0, %c0_8] : memref<5x128xf32, #tpu.memory_space<vmem>>, vector<5x128xf32>
      %c0_9 = arith.constant 0 : index
      %c0_10 = arith.constant 0 : index
      %18 = vector.load %arg3[%c0_9, %c0_10] : memref<5x1xf32, #tpu.memory_space<vmem>>, vector<5x1xf32>
      %19 = vector.broadcast %18 : vector<5x1xf32> to vector<5x128xf32>
      %20 = arith.subf %17, %19 : vector<5x128xf32>
      %21 = tpu.iota {dimensions = array<i32: 1>} : vector<5x128xi32>
      %22 = vector.broadcast %16 : i32 to vector<5x128xi32>
      %23 = arith.addi %21, %22 : vector<5x128xi32>
      %c32_i32 = arith.constant 32 : i32
      %24 = vector.broadcast %c32_i32 : i32 to vector<5x128xi32>
      %25 = arith.cmpi slt, %23, %24 : vector<5x128xi32>
      %cst = arith.constant 0.000000e+00 : f32
      %26 = vector.broadcast %cst : f32 to vector<5x128xf32>
      %27 = arith.select %25, %20, %26 : vector<5x128xi1>, vector<5x128xf32>
      %c0_11 = arith.constant 0 : index
      %c0_12 = arith.constant 0 : index
      %28 = vector.load %arg7[%c0_11, %c0_12] : memref<5x1xf32, #tpu.memory_space<vmem>>, vector<5x1xf32>
      %cst_13 = arith.constant dense<0.000000e+00> : vector<5xf32>
      %29 = vector.multi_reduction <add>, %27, %cst_13 [1] : vector<5x128xf32> to vector<5xf32>
      %30 = vector.shape_cast %29 : vector<5xf32> to vector<5x1xf32>
      %31 = arith.addf %28, %30 : vector<5x1xf32>
      %c0_14 = arith.constant 0 : index
      %c0_15 = arith.constant 0 : index
      %32 = vector.load %arg7[%c0_14, %c0_15] : memref<5x1xf32, #tpu.memory_space<vmem>>, vector<5x1xf32>
      tpu.vector_store %arg7[%c0_14, %c0_15], %31 {strides = array<i32>} : memref<5x1xf32, #tpu.memory_space<vmem>>, vector<5x1xf32>,
      %c0_16 = arith.constant 0 : index
      %c0_17 = arith.constant 0 : index
      %33 = vector.load %arg8[%c0_16, %c0_17] : memref<5x1xf32, #tpu.memory_space<vmem>>, vector<5x1xf32>
      %34 = arith.mulf %27, %27 : vector<5x128xf32>
      %cst_18 = arith.constant dense<0.000000e+00> : vector<5xf32>
      %35 = vector.multi_reduction <add>, %34, %cst_18 [1] : vector<5x128xf32> to vector<5xf32>
      %36 = vector.shape_cast %35 : vector<5xf32> to vector<5x1xf32>
      %37 = arith.addf %33, %36 : vector<5x1xf32>
      %c0_19 = arith.constant 0 : index
      %c0_20 = arith.constant 0 : index
      %38 = vector.load %arg8[%c0_19, %c0_20] : memref<5x1xf32, #tpu.memory_space<vmem>>, vector<5x1xf32>
      tpu.vector_store %arg8[%c0_19, %c0_20], %37 {strides = array<i32>} : memref<5x1xf32, #tpu.memory_space<vmem>>, vector<5x1xf32>,
    } else {
    }
    %c1_i32 = arith.constant 1 : i32
    %8 = arith.cmpi eq, %arg0, %c1_i32 : i32
    %c0_i32_4 = arith.constant 0 : i32
    %9 = arith.cmpi eq, %arg1, %c0_i32_4 : i32
    %10 = arith.andi %8, %9 : i1
    %11 = arith.extui %10 : i1 to i32
    %c0_i32_5 = arith.constant 0 : i32
    %12 = arith.cmpi ne, %11, %c0_i32_5 : i32
    scf.if %12 {
      %c0 = arith.constant 0 : index
      %c0_8 = arith.constant 0 : index
      %16 = vector.load %arg7[%c0, %c0_8] : memref<5x1xf32, #tpu.memory_space<vmem>>, vector<5x1xf32>
      %cst = arith.constant 3.125000e-02 : f32
      %17 = vector.broadcast %cst : f32 to vector<5x1xf32>
      %18 = arith.mulf %16, %17 : vector<5x1xf32>
      %c0_9 = arith.constant 0 : index
      %c0_10 = arith.constant 0 : index
      %19 = vector.load %arg3[%c0_9, %c0_10] : memref<5x1xf32, #tpu.memory_space<vmem>>, vector<5x1xf32>
      %20 = arith.addf %19, %18 : vector<5x1xf32>
      %c0_11 = arith.constant 0 : index
      %c0_12 = arith.constant 0 : index
      %21 = vector.load %arg8[%c0_11, %c0_12] : memref<5x1xf32, #tpu.memory_space<vmem>>, vector<5x1xf32>
      %cst_13 = arith.constant 3.125000e-02 : f32
      %22 = vector.broadcast %cst_13 : f32 to vector<5x1xf32>
      %23 = arith.mulf %21, %22 : vector<5x1xf32>
      %24 = arith.mulf %18, %18 : vector<5x1xf32>
      %25 = arith.subf %23, %24 : vector<5x1xf32>
      %cst_14 = arith.constant 0.000000e+00 : f32
      %26 = vector.broadcast %cst_14 : f32 to vector<5x1xf32>
      %27 = arith.maximumf %25, %26 : vector<5x1xf32>
      %cst_15 = arith.constant 9.99999974E-6 : f32
      %28 = vector.broadcast %cst_15 : f32 to vector<5x1xf32>
      %29 = arith.addf %27, %28 : vector<5x1xf32>
      %30 = math.rsqrt %29 : vector<5x1xf32>
      %c0_16 = arith.constant 0 : index
      %c0_17 = arith.constant 0 : index
      %31 = vector.load %arg4[%c0_16, %c0_17] : memref<5x1xf32, #tpu.memory_space<vmem>>, vector<5x1xf32>
      %32 = arith.mulf %30, %31 : vector<5x1xf32>
      %c0_18 = arith.constant 0 : index
      %c0_19 = arith.constant 0 : index
      %33 = vector.load %arg9[%c0_18, %c0_19] : memref<5x1xf32, #tpu.memory_space<vmem>>, vector<5x1xf32>
      tpu.vector_store %arg9[%c0_18, %c0_19], %32 {strides = array<i32>} : memref<5x1xf32, #tpu.memory_space<vmem>>, vector<5x1xf32>,
      %c0_20 = arith.constant 0 : index
      %c0_21 = arith.constant 0 : index
      %34 = vector.load %arg5[%c0_20, %c0_21] : memref<1x1xf32, #tpu.memory_space<vmem>>, vector<1x1xf32>
      %35 = arith.mulf %20, %32 : vector<5x1xf32>
      %36 = vector.shape_cast %35 : vector<5x1xf32> to vector<1x5x1xf32>
      %cst_22 = arith.constant dense<0.000000e+00> : vector<1xf32>
      %37 = vector.multi_reduction <add>, %36, %cst_22 [1, 2] : vector<1x5x1xf32> to vector<1xf32>
      %38 = vector.shape_cast %37 : vector<1xf32> to vector<1x1x1xf32>
      %39 = vector.extract %38[0, 0, 0] : f32 from vector<1x1x1xf32>
      %40 = vector.broadcast %39 : f32 to vector<1x1xf32>
      %41 = arith.subf %34, %40 : vector<1x1xf32>
      %c0_23 = arith.constant 0 : index
      %c0_24 = arith.constant 0 : index
      %42 = vector.load %arg10[%c0_23, %c0_24] : memref<1x1xf32, #tpu.memory_space<vmem>>, vector<1x1xf32>
      tpu.vector_store %arg10[%c0_23, %c0_24], %41 {strides = array<i32>} : memref<1x1xf32, #tpu.memory_space<vmem>>, vector<1x1xf32>,
    } else {
    }
    %c1_i32_6 = arith.constant 1 : i32
    %13 = arith.cmpi eq, %arg0, %c1_i32_6 : i32
    %14 = arith.extui %13 : i1 to i32
    %c0_i32_7 = arith.constant 0 : i32
    %15 = arith.cmpi ne, %14, %c0_i32_7 : i32
    scf.if %15 {
      %c0 = arith.constant 0 : index
      %c0_8 = arith.constant 0 : index
      %16 = vector.load %arg2[%c0, %c0_8] : memref<5x128xf32, #tpu.memory_space<vmem>>, vector<5x128xf32>
      %c0_9 = arith.constant 0 : index
      %c0_10 = arith.constant 0 : index
      %17 = vector.load %arg9[%c0_9, %c0_10] : memref<5x1xf32, #tpu.memory_space<vmem>>, vector<5x1xf32>
      %18 = vector.broadcast %17 : vector<5x1xf32> to vector<5x128xf32>
      %19 = arith.mulf %16, %18 : vector<5x128xf32>
      %cst = arith.constant dense<0.000000e+00> : vector<128xf32>
      %20 = vector.multi_reduction <add>, %19, %cst [0] : vector<5x128xf32> to vector<128xf32>
      %21 = vector.shape_cast %20 : vector<128xf32> to vector<1x128xf32>
      %c0_11 = arith.constant 0 : index
      %c0_12 = arith.constant 0 : index
      %22 = vector.load %arg10[%c0_11, %c0_12] : memref<1x1xf32, #tpu.memory_space<vmem>>, vector<1x1xf32>
      %23 = vector.broadcast %22 : vector<1x1xf32> to vector<1x128xf32>
      %24 = arith.addf %21, %23 : vector<1x128xf32>
      %c0_13 = arith.constant 0 : index
      %c0_14 = arith.constant 0 : index
      %25 = vector.load %arg6[%c0_13, %c0_14] : memref<1x128xf32, #tpu.memory_space<vmem>>, vector<1x128xf32>
      tpu.vector_store %arg6[%c0_13, %c0_14], %24 {strides = array<i32>} : memref<1x128xf32, #tpu.memory_space<vmem>>, vector<1x128xf32>,
    } else {
    }
    return
  }
  func.func @transform_0(%arg0: i32, %arg1: i32) -> (i32, i32) {
    %c0_i32 = arith.constant 0 : i32
    %c0_i32_0 = arith.constant 0 : i32
    return %c0_i32, %arg1 : i32, i32
  }
  func.func @transform_1(%arg0: i32, %arg1: i32) -> (i32, i32) {
    %c0_i32 = arith.constant 0 : i32
    %c0_i32_0 = arith.constant 0 : i32
    %c0_i32_1 = arith.constant 0 : i32
    return %c0_i32, %c0_i32_0 : i32, i32
  }
  func.func @transform_2(%arg0: i32, %arg1: i32) -> (i32, i32) {
    %c0_i32 = arith.constant 0 : i32
    %c0_i32_0 = arith.constant 0 : i32
    %c0_i32_1 = arith.constant 0 : i32
    return %c0_i32, %c0_i32_0 : i32, i32
  }
  func.func @transform_3(%arg0: i32, %arg1: i32) -> (i32, i32) {
    %c0_i32 = arith.constant 0 : i32
    %c0_i32_0 = arith.constant 0 : i32
    %c0_i32_1 = arith.constant 0 : i32
    return %c0_i32, %c0_i32_0 : i32, i32
  }
  func.func @transform_4(%arg0: i32, %arg1: i32) -> (i32, i32) {
    %0 = arith.muli %arg1, %arg0 : i32
    %c0_i32 = arith.constant 0 : i32
    %c0_i32_0 = arith.constant 0 : i32
    return %c0_i32, %0 : i32, i32
  }
}

</mosaic_0001>

<bundles_post_ra>
// kernel: tpu_custom_call.1
= control target key start
LH: loop header
LB: loop body
LE: loop exit
PB: predicated region body
PF: predicated region fallthrough
CT: control target
= control target key end

     0   :  { %s621_s0 = inlined_call_operand.vmem [shape: f32[5,32], index: 0, kind: input, shape index: {}]   ;;  %s622_s1 = inlined_call_operand.vmem [shape: f32[5,1], index: 1, kind: input, shape index: {}]   ;;  %s623_s2 = inlined_call_operand.vmem [shape: f32[5,1], index: 2, kind: input, shape index: {}]   ;;  %s624_s3 = inlined_call_operand.<no memory space> [shape: f32[1,1], index: 3, kind: input, shape index: {}]   ;;  %s625_s4 = inlined_call_operand.hbm [shape: f32[1,32], index: 4, kind: output, shape index: {}]  }
   0x1   :  { %v9_v0 = vstv %s624_s3 }
   0x2   :  { %10 = vst [vmem:[#allocation6] sm:$0x1] %v9_v0 }
   0x3   :  { %11 = vsyncpa [#allocation8], 0 }
   0x4   :  { %13 = vsyncpa [#allocation8 + $0x1], 0  ;;  %s544_s17 = smov 0   ;;  %s546_s18 = smov 0  }
   0x5   :  { %s548_s19 = smov 0  }
   0x6 LB: > { %s398_s3 = sadd.s32 4294967295, %s510_s19   ;;  %s399_s20 = sadd.s32 4294967294, %s510_s19   ;;  %s510_s19 = sphi %s548_s19, %s19_s19   ;;  %s506_s18 = sphi %s546_s18, %s628_s18   ;;  %s502_s17 = sphi %s544_s17, %s627_s17  }
   0x7   : > { %s31_s21 = sadd.s32 1, %s506_s18  ;;  %p402_p0 = scmp.ge.s32.totalorder %s510_s19, 1 }
   0x8   : > { %p33_p1 = scmp.ge.s32.totalorder %s31_s21, 2  ;;  %p180_p2 = scmp.lt.s32.totalorder %s510_s19, 3 }
   0xa   : > { %s630_s21 = smov (%p33_p1, %s31_s21), 0  ;;  %p181_p3 = pnand %p402_p0, %p180_p2 }
   0xb   : > { %p209_p4 = scmp.eq.s32.totalorder (!%p181_p3), %s502_s17, 0 }
   0xc   : > { %184 = sbr.rel (%p181_p3) target bundleno = 719 (0x2cf), region = 36 }
  0x13   : > { %214 = sbr.rel (!%p209_p4) target bundleno = 26 (0x1a), region = 40  ;;  %vm215_vm0 = vcmask (%p209_p4), 4096   ;;  %v512_v1 = vmov (%p209_p4), 0.0  }
  0x14   : > { %216 = vst.msk [vmem:[#allocation2] sm:$0x1f] (%p209_p4), %vm215_vm0, %v512_v1  ;;  %217 = vst.msk [vmem:[#allocation3] sm:$0x1f] (%p209_p4), %vm215_vm0, %v512_v1 }
  0x1a PF: > { %p404_p5 = scmp.ne.s32.totalorder %s502_s17, 0 }
  0x1b   : > { %v223_v2 = vld [vmem:[%s622_s1] sm:$0x1f] (!%p404_p5)  ;;  %v513_v3 = vmov (!%p404_p5), 0   ;;  %v230_v4 = vlaneseq (!%p404_p5)  ;;  %vm237_vm2 = vcmask (!%p404_p5), 1044480   ;;  %vm242_vm3 = vcmask (!%p404_p5), 4096  }
  0x1c   : > { %220 = sbr.rel (%p404_p5) target bundleno = 308 (0x134), region = 44  ;;  %454 = vset.pattern.permute.xlu0 (!%p404_p5), %v513_v3  ;;  %v222_v6 = vld [vmem:[%s621_s0] sm:$0x1f] (!%p404_p5)  ;;  %v244_v15 = vld [vmem:[#allocation3] sm:$0x1f] (!%p404_p5) }
  0x1d   : > { %226 = vperm.xlu0 (!%p404_p5), %454, %v223_v2   ;;  %v231_v5 = vand.u32 (!%p404_p5), 127, %v230_v4  ;;  %v236_v13 = vld [vmem:[#allocation2] sm:$0x1f] (!%p404_p5) }
  0x1f   : > { %vm234_vm1 = vcmp.lt.s32.totalorder (!%p404_p5), %v231_v5, 32 }
  0x9c   : > { %v227_v7 = vpop.permute.xlu0 %226 }
  0x9d   : > { %v229_v8 = vsub.f32 %v222_v6, %v227_v7 }
  0x9f   : > { %v235_v9 = vsel %vm234_vm1, %v229_v8, 0.0 }
  0xa0   : > { %v238_v10 = vsel %vm237_vm2, %v235_v9, 0.0  ;;  %v245_v11 = vmul.f32 %v235_v9, %v235_v9 }
  0xa1   : > { %239 = vadd.xlane.f32.xlu0 %v238_v10 }
  0xa2   : > { %v246_v12 = vsel %vm237_vm2, %v245_v11, 0.0 }
  0xa3   : > { %247 = vadd.xlane.f32.xlu1 %v246_v12 }
 0x12e   : > { %v240_v14 = vpop.xlane.xlu0 %239 }
 0x12f   : > { %v241_v16 = vadd.f32 %v240_v14, %v236_v13 }
 0x130   : > { %v248_v17 = vpop.xlane.xlu1 %247 }
 0x131   : > { %243 = vst.msk [vmem:[#allocation2] sm:$0x1f] %vm242_vm3, %v241_v16  ;;  %v249_v18 = vadd.f32 %v248_v17, %v244_v15 }
 0x133   : > { %250 = vst.msk [vmem:[#allocation3] sm:$0x1f] %vm242_vm3, %v249_v18 }
 0x134 PF: > { %p251_p6 = scmp.eq.s32.totalorder %s502_s17, 1 }
 0x135   : > { %v258_v27 = vld [vmem:[%s622_s1] sm:$0x1f] (%p251_p6)  ;;  %vm269_vm4 = vcmask (%p251_p6), 4096   ;;  %v271_v41 = vld [vmem:[#allocation6] sm:$0x1] (%p251_p6)  ;;  %vm285_vm5 = vcmask (%p251_p6), 0  }
 0x136   : > { %255 = sbr.rel (!%p251_p6) target bundleno = 547 (0x223), region = 48  ;;  %v267_v28 = vld [vmem:[%s623_s2] sm:$0x1f] (%p251_p6) }
 0x138   : > { %v256_v19 = vld [vmem:[#allocation2] sm:$0x1f] (%p251_p6) }
 0x139   : > { %v257_v21 = vmul.f32 (%p251_p6), 0.03125, %v256_v19 }
 0x13a   : > { %v260_v20 = vld [vmem:[#allocation3] sm:$0x1f] (%p251_p6) }
 0x13b   : > { %v261_v22 = vmul.f32 (%p251_p6), 0.03125, %v260_v20  ;;  %v262_v23 = vmul.f32 (%p251_p6), %v257_v21, %v257_v21  ;;  %v259_v29 = vadd.f32 (%p251_p6), %v258_v27, %v257_v21 }
 0x13d   : > { %v263_v24 = vsub.f32 %v261_v22, %v262_v23 }
 0x13f   : > { %v264_v25 = vmax.f32 %v263_v24, 0.0 }
 0x141   : > { %v265_v26 = vadd.f32 1e-05, %v264_v25 }
 0x143   : > { %455 = vrsqrt.f32 %v265_v26 }
 0x14d   : > { %v456_v30 = vpop.eup %455 }
 0x14e   : > { %v268_v31 = vmul.f32 %v456_v30, %v267_v28 }
 0x150   : > { %270 = vst.msk [vmem:[#allocation4] sm:$0x1f] %vm269_vm4, %v268_v31  ;;  %v272_v32 = vmul.f32 %v268_v31, %v259_v29 }
 0x152   : > { %v273_v33 = vsel %vm269_vm4, %v272_v32, 0.0 }
 0x153   : > { %274 = vadd.xlane.f32.xlu0 %v273_v33 }
 0x1e0   : > { %v275_v34 = vpop.xlane.xlu0 %274 }
 0x1e1   : > { %v276_v35 = vrot.slane %v275_v34, 4 }
 0x1e3   : > { %v277_v36 = vadd.f32 %v276_v35, %v275_v34 }
 0x1e5   : > { %v278_v37 = vrot.slane %v277_v36, 2 }
 0x1e7   : > { %v279_v38 = vadd.f32 %v278_v37, %v277_v36 }
 0x1e9   : > { %v280_v39 = vrot.slane %v279_v38, 1 }
 0x1eb   : > { %v281_v40 = vadd.f32 %v280_v39, %v279_v38 }
 0x1ed   : > { %413 = vpush %v281_v40 }
 0x21e   : > { %s414_s30 = spop %413 }
 0x21f   : > { %v283_v42 = vstv %s414_s30 }
 0x220   : > { %v284_v43 = vsub.f32 %v271_v41, %v283_v42 }
 0x222   : > { %286 = vst.msk [vmem:[#allocation5] sm:$0x1] %vm285_vm5, %v284_v43 }
 0x223 PF: > { %p406_p7 = scmp.ne.s32.totalorder %s502_s17, 1 }
 0x224   : > { %v291_v44 = vld [vmem:[#allocation4] sm:$0x1f] (!%p406_p7)  ;;  %v514_v45 = vmov (!%p406_p7), 0   ;;  %v290_v47 = vld [vmem:[%s621_s0] sm:$0x1f] (!%p406_p7)  ;;  %vm298_vm6 = vcmask (!%p406_p7), 1044480   ;;  %v312_v50 = vlaneseq (!%p406_p7) }
 0x225   : > { %289 = sbr.rel (%p406_p7) target bundleno = 696 (0x2b8), region = 52  ;;  %457 = vset.pattern.permute.xlu0 (!%p406_p7), %v514_v45 }
 0x226   : > { %294 = vperm.xlu0 (!%p406_p7), %457, %v291_v44   ;;  %v313_v54 = vshrl.u32 (!%p406_p7), %v312_v50, 7 }
 0x228   : > { %v314_v57 = vsub.s32 (!%p406_p7), 0, %v313_v54 }
 0x229   : > { %v306_v46 = vld [vmem:[#allocation5] sm:$0x1] (!%p406_p7) }
 0x22a   : > { %309 = vperm.xlu0 (!%p406_p7), %457, %v306_v46  }
 0x2a5   : > { %v295_v48 = vpop.permute.xlu0 %294 }
 0x2a6   : > { %v297_v49 = vmul.f32 %v295_v48, %v290_v47 }
 0x2a8   : > { %v299_v51 = vsel %vm298_vm6, %v297_v49, 0.0 }
 0x2a9   : > { %v300_v52 = vrot.slane %v299_v51, 4  ;;  %v310_v58 = vpop.permute.xlu0 %309 }
 0x2aa   : > { %v315_v61 = vrot.slane %v310_v58, %v314_v57 }
 0x2ab   : > { %v301_v53 = vadd.f32 %v300_v52, %v299_v51 }
 0x2ad   : > { %v302_v55 = vrot.slane %v301_v53, 2 }
 0x2af   : > { %v303_v56 = vadd.f32 %v302_v55, %v301_v53 }
 0x2b1   : > { %v304_v59 = vrot.slane %v303_v56, 1 }
 0x2b3   : > { %v305_v60 = vadd.f32 %v304_v59, %v303_v56 }
 0x2b5   : > { %v316_v62 = vadd.f32 %v315_v61, %v305_v60 }
 0x2b7   : > { %317 = vst [vmem:[#allocation7] sm:$0x1] %v316_v62 }
 0x2b8 PF: > { %p587_p8 = scmp.eq.s32.totalorder %s398_s3, 1  ;;  %s515_s8 = smov [#allocation7]  }
 0x2b9   : > { %s332_s9 = sshll.u32 %s515_s8, 4  ;;  %s333_s9 = int_to_ptr.vmem [resolvable:$true] %s332_s9 }
 0x2ba   : > { %s458_s10 = scalar_lea.vmem %s333_s9, 16  ;;  %s464_s11 = scalar_lea.vmem %s333_s9, 32 }
 0x2bb   : > { %p459_p9 = scmp.ne.s32.totalorder %s333_s9, %s458_s10  ;;  %p465_p12 = scmp.lt.s32.totalorder %s333_s9, %s333_s9 }
 0x2bc   : > { %p466_p13 = scmp.lt.s32.totalorder %s464_s11, %s458_s10 }
 0x2bd   : > { %p460_p10 = pnand %p459_p9, %p587_p8 }
 0x2be   : > { %p467_p0 = por %p466_p13, %p465_p12 }
 0x2bf   : > { %p461_p11 = pneg %p460_p10 }
 0x2c1   : > { %p468_p1 = pnand %p467_p0, %p461_p11 }
 0x2c3   : > { %471 = shalt.err (!%p468_p1)
}
 0x2c4   : > { %s472_s14 = scalar_lea.hbm %s625_s4, 16 }
 0x2c5   : > { %p473_p2 = scmp.ne.s32.totalorder %s625_s4, %s472_s14  ;;  %p478_p5 = scmp.lt.u32.totalorder %s472_s14, %s625_s4 }
 0x2c7   : > { %p474_p3 = pnand %p473_p2, %p587_p8 }
 0x2c9   : > { %p475_p4 = pneg %p474_p3 }
 0x2cb   : > { %p480_p6 = pnand %p478_p5, %p475_p4 }
 0x2cd   : > { %483 = shalt.err (!%p480_p6)
}
 0x2ce   : > { %416 = dma.vmem_to_hbm [thread:$0]  (%p587_p8), %s333_s9, 16, %s625_s4, [#allocation8]  }
 0x2cf PF: > { %p424_p7 = scmp.ge.s32.totalorder %s510_s19, 2  ;;  %p425_p9 = scmp.eq.s32.totalorder %s399_s20, 1 }
 0x2d1   : > { %p420_p10 = pnand %p425_p9, %p424_p7 }
 0x2d3   : > { %497 = dma.done.wait (!%p420_p10), [#allocation8], 16  }
 0x2d4   : > { %499 = vsyncadd (!%p420_p10), [#allocation8], 4294967280  ;;  %s19_s19 = sadd.s32 1, %s510_s19   ;;  %s627_s17 = smov %s506_s18 }
 0x2d5   : > { %p16_p11 = scmp.ge.s32.totalorder %s19_s19, 4   ;;  %s628_s18 = smov %s630_s21 }
 0x2d7   :  { %18 = sbr.rel (!%p16_p11) target bundleno = 6 (0x6), region = 87 }
 0x2de   :  { %349 = vsyncpa [#allocation8], 1 }
 0x2df   :  { %351 = vsyncpa [#allocation8 + $0x1], 1 }

</bundles_post_ra>
